<compile_context>
chip_gen: v7x
topology: tpu7x:2x2x1
jax: 0.10.0
libtpu: 0.0.40
codegen_flags: <defaults>
</compile_context>

<pallas_src>
import jax
import jax.numpy as jnp
import numpy as np
from jax.experimental import pallas as pl
from jax.experimental.pallas import tpu as pltpu

_LANE = 128
_SUBLANE = 8


def _round_up(x, m):
    return ((x + m - 1) // m) * m


def _device_kind():
    try:
        return jax.devices()[0].device_kind.lower()
    except Exception:
        return ""


def _num_parallel_cores():
    """Leading 'parallel' grid-axis size: 1 on single-TC chips, 2 on dual-TC."""
    kind = _device_kind()
    if "lite" in kind or "v5e" in kind or "v6" in kind:
        return 1                      # v5e / v6e: single TensorCore
    if "v7" in kind or "v4" in kind or "v5p" in kind:
        return 2                      # v7x (2 TCs) / v4, v5p megacore
    return 1


def _vmem_limit_and_force_budget():
    """(vmem_limit_bytes, VMEM byte budget for the 4 force buffers)."""
    phys = None
    try:
        phys = int(pltpu.get_tpu_info().vmem_capacity_bytes)
    except Exception:
        phys = None
    if phys is None:
        phys = 64 * 1024 * 1024 if "v7" in _device_kind() else 128 * 1024 * 1024
    # 64 MiB scoped limit on 128 MiB parts (v5e/v6e), 32 MiB on the 64 MiB v7x.
    limit = 32 * 1024 * 1024 if phys <= 64 * 1024 * 1024 else 64 * 1024 * 1024
    # 2 force inputs x 2 pipeline buffers; leave headroom for the (tiny) energy
    # blocks, the resident output block and Mosaic-internal scratch.
    return limit, (limit * 3) // 4


def _pick_tiles(nconfigs, f_dim, itemsize, force_budget, num_cores,
                tile_n=None, tile_f=None):
    """Choose (TN, TF): TN configs on the sublane axis, TF components on lanes."""
    f_pad = _round_up(max(f_dim, 1), _LANE)

    # --- F (lane) tile: only tile F if a >=512-config tile would not fit ----
    if tile_f is not None:
        tf = max(_LANE, (int(tile_f) // _LANE) * _LANE)
    else:
        min_tn = min(512, _round_up(nconfigs, _SUBLANE))
        if 4 * min_tn * f_pad * itemsize <= force_budget:
            tf = f_dim
        else:
            tf = (force_budget // (4 * itemsize * min_tn) // _LANE) * _LANE
            tf = max(_LANE, int(tf))
    if tf >= f_dim:
        tf = f_dim

    # --- N (sublane) tile: as large as the VMEM budget allows ---------------
    tf_pad = _round_up(tf, _LANE)          # VMEM lanes are padded to 128
    if tile_n is not None:
        tn = int(tile_n)
    else:
        tn = int(force_budget // (4 * itemsize * tf_pad))
    per_core = pl.cdiv(nconfigs, num_cores)  # give every TensorCore real work
    tn = min(tn, _round_up(per_core, _SUBLANE))
    tn = max(_SUBLANE, (tn // _SUBLANE) * _SUBLANE)
    if tn >= nconfigs:
        tn = nconfigs
    return tn, tf


def _make_wmse_kernel(tile_n, tile_f, f_dim, n_true, tiles_per_core,
                      needs_cfg_mask, needs_f_mask):
    """Kernel factory closing over the static tiling parameters."""

    def kernel(params_ref, en2_ref, f_ref, fp_ref, out_ref):
        c = pl.program_id(0)    # TensorCore ("parallel") axis
        t = pl.program_id(1)    # config-tile reduction axis
        ft = pl.program_id(2)   # force-component reduction axis (innermost)

        @pl.when((t == 0) & (ft == 0))
        def _init():
            out_ref[...] = jnp.zeros_like(out_ref)

        # SMEM scalars: [en_std, dwt, enmin - en_mean, 1/N, f_lambda/(3*natoms*N)]
        en_std = params_ref[0]
        dwt = params_ref[1]
        enmin_c = params_ref[2]
        e_scale = params_ref[3]
        f_scale = params_ref[4]

        en_raw = en2_ref[:, 0:1]     # (TN, 1) scaled target energies
        enp_raw = en2_ref[:, 1:2]    # (TN, 1) scaled predicted energies

        # w = dwt / (dwt + _en - enmin); descale folded so en_mean cancels.
        # Exact divide kept (vs pl.reciprocal(approx=True)): it is one (TN,1)
        # column per step, invisible next to the force DMA, and keeps f32-level
        # accuracy for the 1e-5 correctness check.
        w = dwt / (dwt + (en_raw * en_std - enmin_c))
        ediff = (en_raw - enp_raw) * en_std

        # Force tile (TN, TF) in its natural HBM layout; upcast bf16 -> f32.
        df = f_ref[...].astype(jnp.float32) - fp_ref[...].astype(jnp.float32)
        if needs_f_mask:   # partial last F tile: zero padded lanes (select)
            lane = jax.lax.broadcasted_iota(jnp.int32, (1, tile_f), 1)
            df = jnp.where(lane + ft * tile_f < f_dim, df, 0.0)
        per_cfg = jnp.sum(df * df, axis=1, keepdims=True)   # (TN,1) lane reduce

        # Energy term contributes only on the first F tile of each config tile.
        e_gate = jnp.where(ft == 0, e_scale, 0.0)
        contrib = w * (per_cfg * f_scale + ediff * ediff * e_gate)

        if needs_cfg_mask:  # partial last config tile / phantom megacore tile
            start = (c * tiles_per_core + t) * tile_n
            row = jax.lax.broadcasted_iota(jnp.int32, (tile_n, 1), 0)
            contrib = jnp.where(start + row < n_true, contrib, 0.0)

        out_ref[...] += contrib[None, :, :]

    return kernel


def _force_cast(x):
    x = jnp.asarray(x)
    if x.dtype == jnp.bfloat16:
        return x            # keep bf16 in HBM (half the DMA bytes); kernel upcasts
    return x.astype(jnp.float32)


def wmse_loss_ratio_wforces(en, en_pred, forces, forces_pred, *,
                            natoms, en_mean, en_std, dwt=1.0, f_lambda=1.0,
                            tile_n=None, tile_f=None):
    """Forward pass of WMSELoss_Ratio_wforces. Returns a scalar f32 loss."""
    nconfigs = forces.shape[0]
    F = 3 * natoms

    en_flat = jnp.asarray(en, jnp.float32).reshape(-1)
    enp_flat = jnp.asarray(en_pred, jnp.float32).reshape(-1)
    assert en_flat.shape[0] == nconfigs, "energy array must have one value per config"

    # Natural layouts (contiguous reshapes only, NO transpose / HBM copy):
    #   forces:  (nconfigs, 3*natoms)  -> configs on sublanes, comps on lanes
    #   energies: (nconfigs, 2)        -> one small DMA instead of two
    f2 = _force_cast(forces).reshape(nconfigs, F)
    fp2 = _force_cast(forces_pred).reshape(nconfigs, F)
    en2 = jnp.stack([en_flat, enp_flat], axis=1)

    en_mean32 = jnp.asarray(en_mean, jnp.float32).reshape(())
    en_std32 = jnp.asarray(en_std, jnp.float32).reshape(())
    dwt32 = jnp.asarray(dwt, jnp.float32).reshape(())
    f_lambda32 = jnp.asarray(f_lambda, jnp.float32).reshape(())

    # Global min hoisted out of the kernel (required once configs are tiled).
    enmin = jnp.min(en_flat * en_std32 + en_mean32)
    enmin_c = (enmin - en_mean32).astype(jnp.float32)        # enmin - en_mean

    e_scale = jnp.asarray(1.0 / nconfigs, jnp.float32)
    f_scale = f_lambda32 / jnp.asarray(3.0 * natoms * nconfigs, jnp.float32)
    params = jnp.stack([en_std32, dwt32, enmin_c, e_scale, f_scale])

    num_cores = _num_parallel_cores()
    vmem_limit, force_budget = _vmem_limit_and_force_budget()
    itemsize = max(int(jnp.dtype(f2.dtype).itemsize),
                   int(jnp.dtype(fp2.dtype).itemsize))

    TN, TF = _pick_tiles(nconfigs, F, itemsize, force_budget, num_cores,
                         tile_n=tile_n, tile_f=tile_f)
    ntiles = pl.cdiv(nconfigs, TN)
    tiles_per_core = pl.cdiv(ntiles, num_cores)
    tiles_f = pl.cdiv(F, TF)

    needs_cfg_mask = (num_cores * tiles_per_core * TN != nconfigs)
    needs_f_mask = (TF < F) and (F % TF != 0)

    def tile_idx(c, t):
        # Clamp so a phantom tile (odd tile count on a dual-core chip) re-reads
        # a valid block; its rows are masked off (select) inside the kernel.
        return jnp.minimum(c * tiles_per_core + t, ntiles - 1)

    en_spec = pl.BlockSpec((TN, 2), lambda c, t, ft, p: (tile_idx(c, t), 0))
    f_spec = pl.BlockSpec((TN, TF), lambda c, t, ft, p: (tile_idx(c, t), ft))
    out_spec = pl.BlockSpec((1, TN, 1), lambda c, t, ft, p: (c, 0, 0))

    cost = pl.CostEstimate(
        flops=3 * nconfigs * F + 12 * nconfigs,
        transcendentals=nconfigs,                       # the per-config divide
        bytes_accessed=2 * nconfigs * F * itemsize + nconfigs * 8
        + num_cores * TN * 4,
    )

    kernel = _make_wmse_kernel(TN, TF, F, nconfigs, tiles_per_core,
                               needs_cfg_mask, needs_f_mask)

    out = pl.pallas_call(
        kernel,
        out_shape=jax.ShapeDtypeStruct((num_cores, TN, 1), jnp.float32),
        grid_spec=pltpu.PrefetchScalarGridSpec(
            num_scalar_prefetch=1,
            grid=(num_cores, tiles_per_core, tiles_f),
            in_specs=[en_spec, f_spec, f_spec],
            out_specs=out_spec,
        ),
        compiler_params=pltpu.CompilerParams(
            dimension_semantics=("parallel", "arbitrary", "arbitrary"),
            vmem_limit_bytes=vmem_limit,
        ),
        cost_estimate=cost,
    )(params, en2, f2, fp2)

    # per-core, per-config partials -> scalar
    return jnp.sum(out)


def _reference_loss(en, en_pred, forces, forces_pred, *,
                    natoms, en_mean, en_std, dwt, f_lambda):
    """Pure-JAX mirror of the PyTorch forward(), for verification."""
    nconfigs = forces.shape[0]
    _en = en * en_std + en_mean
    _en_pred = en_pred * en_std + en_mean
    enmin = _en.min()
    w = dwt / (dwt + _en - enmin)
    wmse_en = jnp.mean(w * (_en - _en_pred) ** 2)
    fp = forces_pred.reshape(nconfigs, natoms, 3)
    df = forces.reshape(nconfigs, natoms, 3) - fp
    wdf = jnp.einsum('ijk,il->ijk', df, w)
    wmse_forces = (f_lambda * jnp.einsum('ijk,ijk->i', wdf, df).sum()
                   / (3.0 * natoms) / nconfigs)
    return wmse_en + wmse_forces


if __name__ == "__main__":
    key = jax.random.PRNGKey(0)
    keys = jax.random.split(key, 12)
    en_mean, en_std, dwt, f_lambda = -2.5, 0.7, 1.0, 0.5

    # --- test 1: tiny problem, single tile -----------------------------------
    nconfigs, natoms = 8, 5
    en = jax.random.normal(keys[0], (nconfigs, 1), dtype=jnp.float32)
    en_pred = en + 0.1 * jax.random.normal(keys[1], (nconfigs, 1), dtype=jnp.float32)
    forces = jax.random.normal(keys[2], (nconfigs, natoms, 3), dtype=jnp.float32)
    forces_pred = jax.random.normal(keys[3], (nconfigs, natoms * 3), dtype=jnp.float32)

    loss = wmse_loss_ratio_wforces(
        en, en_pred, forces, forces_pred,
        natoms=natoms, en_mean=en_mean, en_std=en_std, dwt=dwt, f_lambda=f_lambda)
    loss = jax.block_until_ready(loss)
    ref = _reference_loss(
        en, en_pred, forces, forces_pred,
        natoms=natoms, en_mean=en_mean, en_std=en_std, dwt=dwt, f_lambda=f_lambda)
    assert np.allclose(np.asarray(loss), np.asarray(ref), rtol=1e-5, atol=1e-5), (loss, ref)

    # --- test 2: multi config-tile grid with a partial last tile -------------
    nconfigs2, natoms2 = 300, 7
    en2 = jax.random.normal(keys[4], (nconfigs2, 1), dtype=jnp.float32)
    en_pred2 = en2 + 0.05 * jax.random.normal(keys[5], (nconfigs2, 1), dtype=jnp.float32)
    forces2 = jax.random.normal(keys[6], (nconfigs2, natoms2, 3), dtype=jnp.float32)
    forces_pred2 = jax.random.normal(keys[7], (nconfigs2, natoms2, 3), dtype=jnp.float32)

    loss2 = wmse_loss_ratio_wforces(
        en2, en_pred2, forces2, forces_pred2,
        natoms=natoms2, en_mean=en_mean, en_std=en_std, dwt=dwt, f_lambda=f_lambda,
        tile_n=128)
    loss2 = jax.block_until_ready(loss2)
    ref2 = _reference_loss(
        en2, en_pred2, forces2, forces_pred2,
        natoms=natoms2, en_mean=en_mean, en_std=en_std, dwt=dwt, f_lambda=f_lambda)
    assert np.allclose(np.asarray(loss2), np.asarray(ref2), rtol=1e-5, atol=1e-5), (loss2, ref2)

    # --- test 3: F-axis tiling (partial last F tile) + partial config tile ---
    nconfigs3, natoms3 = 40, 50            # F = 150 > 128 -> two F tiles
    en3 = jax.random.normal(keys[8], (nconfigs3, 1), dtype=jnp.float32)
    en_pred3 = en3 + 0.05 * jax.random.normal(keys[9], (nconfigs3, 1), dtype=jnp.float32)
    forces3 = jax.random.normal(keys[10], (nconfigs3, natoms3, 3), dtype=jnp.float32)
    forces_pred3 = jax.random.normal(keys[11], (nconfigs3, natoms3 * 3), dtype=jnp.float32)

    loss3 = wmse_loss_ratio_wforces(
        en3, en_pred3, forces3, forces_pred3,
        natoms=natoms3, en_mean=en_mean, en_std=en_std, dwt=dwt, f_lambda=f_lambda,
        tile_n=16, tile_f=128)
    loss3 = jax.block_until_ready(loss3)
    ref3 = _reference_loss(
        en3, en_pred3, forces3, forces_pred3,
        natoms=natoms3, en_mean=en_mean, en_std=en_std, dwt=dwt, f_lambda=f_lambda)
    assert np.allclose(np.asarray(loss3), np.asarray(ref3), rtol=1e-5, atol=1e-5), (loss3, ref3)

    print("KERNEL_OK")
</pallas_src>

<mosaic_0001>
module attributes {stable_mosaic.version = 11 : i64} {
  func.func @kernel(%arg0: i32, %arg1: i32, %arg2: i32, %arg3: memref<5xf32, #tpu.memory_space<smem>>, %arg4: memref<8x2xf32, #tpu.memory_space<vmem>>, %arg5: memref<8x15xf32, #tpu.memory_space<vmem>>, %arg6: memref<8x15xf32, #tpu.memory_space<vmem>>, %arg7: memref<1x8x1xf32, #tpu.memory_space<vmem>>) attributes {dimension_semantics = [#tpu.dimension_semantics<parallel>, #tpu.dimension_semantics<arbitrary>, #tpu.dimension_semantics<arbitrary>], iteration_bounds = array<i64: 1, 1, 1>, scalar_prefetch = 1 : i64, scratch_operands = 0 : i64, tpu.core_type = #tpu.core_type<tc>, window_params = [{transform_indices = @transform_0, window_bounds = array<i64: 8, 2>}, {transform_indices = @transform_1, window_bounds = array<i64: 8, 15>}, {transform_indices = @transform_2, window_bounds = array<i64: 8, 15>}, {transform_indices = @transform_3, window_bounds = array<i64: 1, 8, 1>}]} {
    %c0_i32 = arith.constant 0 : i32
    %0 = arith.cmpi eq, %arg1, %c0_i32 : i32
    %c0_i32_0 = arith.constant 0 : i32
    %1 = arith.cmpi eq, %arg2, %c0_i32_0 : i32
    %2 = arith.andi %0, %1 : i1
    %3 = arith.extui %2 : i1 to i32
    %c0_i32_1 = arith.constant 0 : i32
    %4 = arith.cmpi ne, %3, %c0_i32_1 : i32
    scf.if %4 {
      %cst_18 = arith.constant 0.000000e+00 : f32
      %42 = vector.broadcast %cst_18 : f32 to vector<1x8x1xf32>
      %c0_19 = arith.constant 0 : index
      %c0_20 = arith.constant 0 : index
      %c0_21 = arith.constant 0 : index
      %43 = vector.load %arg7[%c0_19, %c0_20, %c0_21] : memref<1x8x1xf32, #tpu.memory_space<vmem>>, vector<1x8x1xf32>
      tpu.vector_store %arg7[%c0_19, %c0_20, %c0_21], %42 {strides = array<i32>} : memref<1x8x1xf32, #tpu.memory_space<vmem>>, vector<1x8x1xf32>,
    } else {
    }
    %c0 = arith.constant 0 : index
    %5 = memref.load %arg3[%c0] : memref<5xf32, #tpu.memory_space<smem>>
    %c1 = arith.constant 1 : index
    %6 = memref.load %arg3[%c1] : memref<5xf32, #tpu.memory_space<smem>>
    %c2 = arith.constant 2 : index
    %7 = memref.load %arg3[%c2] : memref<5xf32, #tpu.memory_space<smem>>
    %c3 = arith.constant 3 : index
    %8 = memref.load %arg3[%c3] : memref<5xf32, #tpu.memory_space<smem>>
    %c4 = arith.constant 4 : index
    %9 = memref.load %arg3[%c4] : memref<5xf32, #tpu.memory_space<smem>>
    %c0_2 = arith.constant 0 : index
    %c0_3 = arith.constant 0 : index
    %10 = vector.load %arg4[%c0_2, %c0_3] : memref<8x2xf32, #tpu.memory_space<vmem>>, vector<8x1xf32>
    %c0_4 = arith.constant 0 : index
    %c1_5 = arith.constant 1 : index
    %11 = vector.load %arg4[%c0_4, %c1_5] : memref<8x2xf32, #tpu.memory_space<vmem>>, vector<8x1xf32>
    %12 = vector.broadcast %5 : f32 to vector<8x1xf32>
    %13 = arith.mulf %10, %12 : vector<8x1xf32>
    %14 = vector.broadcast %7 : f32 to vector<8x1xf32>
    %15 = arith.subf %13, %14 : vector<8x1xf32>
    %16 = vector.broadcast %6 : f32 to vector<8x1xf32>
    %17 = arith.addf %16, %15 : vector<8x1xf32>
    %18 = vector.broadcast %6 : f32 to vector<8x1xf32>
    %19 = arith.divf %18, %17 : vector<8x1xf32>
    %20 = arith.subf %10, %11 : vector<8x1xf32>
    %21 = vector.broadcast %5 : f32 to vector<8x1xf32>
    %22 = arith.mulf %20, %21 : vector<8x1xf32>
    %c0_6 = arith.constant 0 : index
    %c0_7 = arith.constant 0 : index
    %23 = vector.load %arg5[%c0_6, %c0_7] : memref<8x15xf32, #tpu.memory_space<vmem>>, vector<8x15xf32>
    %c0_8 = arith.constant 0 : index
    %c0_9 = arith.constant 0 : index
    %24 = vector.load %arg6[%c0_8, %c0_9] : memref<8x15xf32, #tpu.memory_space<vmem>>, vector<8x15xf32>
    %25 = arith.subf %23, %24 : vector<8x15xf32>
    %26 = arith.mulf %25, %25 : vector<8x15xf32>
    %cst = arith.constant dense<0.000000e+00> : vector<8xf32>
    %27 = vector.multi_reduction <add>, %26, %cst [1] : vector<8x15xf32> to vector<8xf32>
    %28 = vector.shape_cast %27 : vector<8xf32> to vector<8x1xf32>
    %c0_i32_10 = arith.constant 0 : i32
    %29 = arith.cmpi eq, %arg2, %c0_i32_10 : i32
    %cst_11 = arith.constant 0.000000e+00 : f32
    %30 = arith.select %29, %8, %cst_11 : f32
    %31 = vector.broadcast %9 : f32 to vector<8x1xf32>
    %32 = arith.mulf %28, %31 : vector<8x1xf32>
    %33 = arith.mulf %22, %22 : vector<8x1xf32>
    %34 = vector.broadcast %30 : f32 to vector<8x1xf32>
    %35 = arith.mulf %33, %34 : vector<8x1xf32>
    %36 = arith.addf %32, %35 : vector<8x1xf32>
    %37 = arith.mulf %19, %36 : vector<8x1xf32>
    %c0_12 = arith.constant 0 : index
    %c0_13 = arith.constant 0 : index
    %c0_14 = arith.constant 0 : index
    %38 = vector.load %arg7[%c0_12, %c0_13, %c0_14] : memref<1x8x1xf32, #tpu.memory_space<vmem>>, vector<1x8x1xf32>
    %39 = vector.shape_cast %37 : vector<8x1xf32> to vector<1x8x1xf32>
    %40 = arith.addf %38, %39 : vector<1x8x1xf32>
    %c0_15 = arith.constant 0 : index
    %c0_16 = arith.constant 0 : index
    %c0_17 = arith.constant 0 : index
    %41 = vector.load %arg7[%c0_15, %c0_16, %c0_17] : memref<1x8x1xf32, #tpu.memory_space<vmem>>, vector<1x8x1xf32>
    tpu.vector_store %arg7[%c0_15, %c0_16, %c0_17], %40 {strides = array<i32>} : memref<1x8x1xf32, #tpu.memory_space<vmem>>, vector<1x8x1xf32>,
    return
  }
  func.func @transform_0(%arg0: i32, %arg1: i32, %arg2: i32, %arg3: memref<5xf32, #tpu.memory_space<smem>>) -> (i32, i32) {
    %c1_i32 = arith.constant 1 : i32
    %0 = arith.muli %arg0, %c1_i32 : i32
    %1 = arith.addi %0, %arg1 : i32
    %c0_i32 = arith.constant 0 : i32
    %2 = arith.minsi %1, %c0_i32 : i32
    %c0_i32_0 = arith.constant 0 : i32
    %c0_i32_1 = arith.constant 0 : i32
    return %2, %c0_i32_0 : i32, i32
  }
  func.func @transform_1(%arg0: i32, %arg1: i32, %arg2: i32, %arg3: memref<5xf32, #tpu.memory_space<smem>>) -> (i32, i32) {
    %c1_i32 = arith.constant 1 : i32
    %0 = arith.muli %arg0, %c1_i32 : i32
    %1 = arith.addi %0, %arg1 : i32
    %c0_i32 = arith.constant 0 : i32
    %2 = arith.minsi %1, %c0_i32 : i32
    %c0_i32_0 = arith.constant 0 : i32
    return %2, %arg2 : i32, i32
  }
  func.func @transform_2(%arg0: i32, %arg1: i32, %arg2: i32, %arg3: memref<5xf32, #tpu.memory_space<smem>>) -> (i32, i32) {
    %c1_i32 = arith.constant 1 : i32
    %0 = arith.muli %arg0, %c1_i32 : i32
    %1 = arith.addi %0, %arg1 : i32
    %c0_i32 = arith.constant 0 : i32
    %2 = arith.minsi %1, %c0_i32 : i32
    %c0_i32_0 = arith.constant 0 : i32
    return %2, %arg2 : i32, i32
  }
  func.func @transform_3(%arg0: i32, %arg1: i32, %arg2: i32, %arg3: memref<5xf32, #tpu.memory_space<smem>>) -> (i32, i32, i32) {
    %c0_i32 = arith.constant 0 : i32
    %c0_i32_0 = arith.constant 0 : i32
    %c0_i32_1 = arith.constant 0 : i32
    return %arg0, %c0_i32, %c0_i32_0 : i32, i32, i32
  }
}

</mosaic_0001>

<bundles_post_ra>
// kernel: tpu_custom_call.1
= control target key start
LH: loop header
LB: loop body
LE: loop exit
PB: predicated region body
PF: predicated region fallthrough
CT: control target
= control target key end

     0   :  { %s362_s0 = inlined_call_operand.hbm [shape: f32[5], index: 0, kind: input, shape index: {}]   ;;  %s363_s1 = inlined_call_operand.hbm [shape: f32[8,2], index: 1, kind: input, shape index: {}]   ;;  %s364_s2 = inlined_call_operand.hbm [shape: f32[8,15], index: 2, kind: input, shape index: {}]   ;;  %s365_s3 = inlined_call_operand.hbm [shape: f32[8,15], index: 3, kind: input, shape index: {}]   ;;  %s366_s4 = inlined_call_operand.hbm [shape: f32[1,8,1], index: 4, kind: output, shape index: {}]  }
   0x1   :  { %s162_s17 = scalar_lea.hbm %s362_s0, 16 }
   0x2   :  { %p163_p0 = scmp.ne.s32.totalorder %s362_s0, %s162_s17  ;;  %p166_p1 = scmp.lt.u32.totalorder %s162_s17, %s362_s0 }
   0x4   :  { %p168_p2 = pnand %p166_p1, %p163_p0 }
   0x6   :  { %171 = shalt.err (!%p168_p2)  }
   0x7   :  { %s268_s22 = smov [#allocation3]  }
   0x8   :  { %10 = dma.hbm_to_smem %s362_s0, 16, %s268_s22, [#allocation2] }
   0x9   :  { %260 = dma.done.wait [#allocation2], 16 }
   0xa   :  { %261 = vsyncadd [#allocation2], 4294967280 }
   0xb   :  { %12 = sfence }
   0xc   :  { %13 = vsyncpa [#allocation5], 0 }
   0xd   :  { %14 = vsyncpa [#allocation8], 0 }
   0xe   :  { %15 = vsyncpa [#allocation6], 0  ;;  %s269_s25 = smov [#allocation7]   ;;  %s270_s27 = smov [#allocation4]  }
   0xf   :  { %s42_s26 = sshll.u32 %s269_s25, 4  ;;  %s27_s28 = sshll.u32 %s270_s27, 4  ;;  %s43_s26 = int_to_ptr.vmem [resolvable:$true] %s42_s26  ;;  %s28_s28 = int_to_ptr.vmem [resolvable:$true] %s27_s28 }
  0x10   :  { %s172_s5 = scalar_lea.hbm %s364_s2, 128 }
  0x11   :  { %p173_p3 = scmp.ne.s32.totalorder %s364_s2, %s172_s5  ;;  %p176_p4 = scmp.lt.u32.totalorder %s172_s5, %s364_s2 }
  0x13   :  { %p178_p5 = pnand %p176_p4, %p173_p3 }
  0x15   :  { %181 = shalt.err (!%p178_p5)
}
  0x16   :  { %s182_s9 = scalar_lea.vmem %s43_s26, 128  ;;  %p187_p7 = scmp.lt.s32.totalorder %s43_s26, %s43_s26 }
  0x17   :  { %p183_p6 = scmp.ne.s32.totalorder %s43_s26, %s182_s9  ;;  %p188_p8 = scmp.lt.s32.totalorder %s182_s9, %s182_s9 }
  0x19   :  { %p189_p9 = por %p188_p8, %p187_p7 }
  0x1b   :  { %p190_p10 = pnand %p189_p9, %p183_p6 }
  0x1d   :  { %193 = shalt.err (!%p190_p10)
}
  0x1e   :  { %45 = dma.hbm_to_vmem [thread:$0]  %s364_s2, 128, %s43_s26, [#allocation8]  }
  0x1f   :  { %s194_s14 = scalar_lea.hbm %s363_s1, 128 }
  0x20   :  { %p195_p11 = scmp.ne.s32.totalorder %s363_s1, %s194_s14  ;;  %p198_p12 = scmp.lt.u32.totalorder %s194_s14, %s363_s1 }
  0x22   :  { %p200_p13 = pnand %p198_p12, %p195_p11 }
  0x24   :  { %203 = shalt.err (!%p200_p13)
}
  0x25   :  { %s204_s19 = scalar_lea.vmem %s28_s28, 128  ;;  %p209_p1 = scmp.lt.s32.totalorder %s28_s28, %s28_s28 }
  0x26   :  { %p205_p0 = scmp.ne.s32.totalorder %s28_s28, %s204_s19  ;;  %p210_p2 = scmp.lt.s32.totalorder %s204_s19, %s204_s19 }
  0x28   :  { %p211_p3 = por %p210_p2, %p209_p1 }
  0x2a   :  { %p212_p4 = pnand %p211_p3, %p205_p0 }
  0x2c   :  { %215 = shalt.err (!%p212_p4)
}
  0x2d   :  { %30 = dma.hbm_to_vmem [thread:$0]  %s363_s1, 128, %s28_s28, [#allocation5]  }
  0x2e   :  { %s271_s21 = smov [#allocation9]   ;;  %s216_s25 = scalar_lea.hbm %s365_s3, 128 }
  0x2f   :  { %s57_s22 = sshll.u32 %s271_s21, 4  ;;  %p217_p5 = scmp.ne.s32.totalorder %s365_s3, %s216_s25  ;;  %s58_s22 = int_to_ptr.vmem [resolvable:$true] %s57_s22 }
  0x30   :  { %p220_p6 = scmp.lt.u32.totalorder %s216_s25, %s365_s3 }
  0x32   :  { %p222_p7 = pnand %p220_p6, %p217_p5 }
  0x34   :  { %225 = shalt.err (!%p222_p7)
}
  0x35   :  { %s226_s5 = scalar_lea.vmem %s58_s22, 128  ;;  %p231_p9 = scmp.lt.s32.totalorder %s58_s22, %s58_s22 }
  0x36   :  { %p227_p8 = scmp.ne.s32.totalorder %s58_s22, %s226_s5  ;;  %p232_p10 = scmp.lt.s32.totalorder %s226_s5, %s226_s5 }
  0x38   :  { %p233_p11 = por %p232_p10, %p231_p9 }
  0x3a   :  { %p234_p12 = pnand %p233_p11, %p227_p8 }
  0x3c   :  { %237 = shalt.err (!%p234_p12)
}
  0x3d   :  { %60 = dma.hbm_to_vmem [thread:$0]  %s365_s3, 128, %s58_s22, [#allocation8]  }
  0x3e   :  { %262 = dma.done.wait [#allocation5], 128  }
  0x3f   :  { %263 = vsyncadd [#allocation5], 4294967168 }
  0x40   :  { %264 = dma.done.wait [#allocation8], 256  }
  0x41   :  { %265 = vsyncadd [#allocation8], 4294967040  ;;  %v107_v0 = vld [vmem:[#allocation7] sm:$0xff]  ;;  %v108_v1 = vld [vmem:[#allocation9] sm:$0xff]  ;;  %vm111_vm0 = vcmask 121856   ;;  %vm85_vm1 = vcmask 7168  }
  0x42   :  { %v109_v2 = vsub.f32 %v107_v0, %v108_v1  ;;  %v92_v5 = vld [vmem:[#allocation4] sm:$0xff]  ;;  %s272_s6 = smov 127   ;;  %v273_v6 = vmov 0.0   ;;  %s87_s7 = sld [smem:[#allocation3]] }
  0x43   :  { %86 = vst.msk [vmem:[#allocation10] sm:$0xff] %vm85_vm1, %v273_v6  ;;  %s150_s3 = sld [smem:[#allocation3 + $0x2]]  ;;  %s149_s0 = sld [smem:[#allocation3 + $0x1]] }
  0x44   :  { %v110_v3 = vmul.f32 %v109_v2, %v109_v2  ;;  %s152_s8 = sld [smem:[#allocation3 + $0x4]]  ;;  %s151_s9 = sld [smem:[#allocation3 + $0x3]] }
  0x45   :  { %s274_s10 = smov [#allocation10]  }
  0x46   :  { %v112_v4 = vsel %vm111_vm0, %v110_v3, 0.0  ;;  %s133_s11 = sshll.u32 %s274_s10, 4  ;;  %s134_s11 = int_to_ptr.vmem [resolvable:$true] %s133_s11 }
  0x47   :  { %113 = vadd.xlane.f32.xlu0 %v112_v4  ;;  %s238_s12 = scalar_lea.vmem %s134_s11, 128  ;;  %p243_p0 = scmp.lt.s32.totalorder %s134_s11, %s134_s11 }
  0x48   :  { %v93_v7 = vstv %s87_s7  ;;  %p239_p13 = scmp.ne.s32.totalorder %s134_s11, %s238_s12  ;;  %p244_p1 = scmp.lt.s32.totalorder %s238_s12, %s238_s12 }
  0x49   :  { %v94_v8 = vmul.f32 %v93_v7, %v92_v5  ;;  %v95_v9 = vstv %s150_s3  ;;  %v97_v11 = vstv %s149_s0 }
  0x4a   :  { %v116_v18 = vstv %s152_s8  ;;  %v119_v19 = vstv %s151_s9  ;;  %v123_v25 = vld [vmem:[#allocation10] sm:$0xff]  ;;  %p245_p2 = por %p244_p1, %p243_p0 }
  0x4b   :  { %v96_v10 = vsub.f32 %v94_v8, %v95_v9 }
  0x4c   :  { %p246_p3 = pnand %p245_p2, %p239_p13 }
  0x4d   :  { %v98_v12 = vadd.f32 %v97_v11, %v96_v10 }
  0x4f   :  { %160 = vrcp.f32 %v98_v12 }
  0x59   :  { %v161_v17 = vpop.eup %160 }
  0x5a   :  { %v100_v22 = vmul.f32 %v161_v17, %v97_v11 }
  0x5d   :  { %102 = vrot.lane.b32.xlu0 %v92_v5, %s272_s6 }
  0xd4   :  { %v114_v13 = vpop.xlane.xlu0 %113 }
  0xd5   :  { %v117_v21 = vmul.f32 %v116_v18, %v114_v13 }
  0xd8   :  { %v103_v14 = vpop.permute.xlu0 %102 }
  0xd9   :  { %v105_v15 = vsub.f32 %v92_v5, %v103_v14 }
  0xdb   :  { %v106_v16 = vmul.f32 %v105_v15, %v93_v7 }
  0xdd   :  { %v118_v20 = vmul.f32 %v106_v16, %v106_v16 }
  0xdf   :  { %v120_v23 = vmul.f32 %v119_v19, %v118_v20 }
  0xe1   :  { %v121_v24 = vadd.f32 %v120_v23, %v117_v21 }
  0xe3   :  { %v122_v26 = vmul.f32 %v121_v24, %v100_v22 }
  0xe5   :  { %v124_v27 = vadd.f32 %v123_v25, %v122_v26 }
  0xe7   :  { %126 = vst.msk [vmem:[#allocation10] sm:$0xff] %vm85_vm1, %v124_v27 }
  0xe8   :  { %249 = shalt.err (!%p246_p3)
}
  0xe9   :  { %s250_s15 = scalar_lea.hbm %s366_s4, 128 }
  0xea   :  { %p251_p4 = scmp.ne.s32.totalorder %s366_s4, %s250_s15  ;;  %p254_p5 = scmp.lt.u32.totalorder %s250_s15, %s366_s4 }
  0xec   :  { %p256_p6 = pnand %p254_p5, %p251_p4 }
  0xee   :  { %259 = shalt.err (!%p256_p6)
}
  0xef   :  { %136 = dma.vmem_to_hbm [thread:$0]  %s134_s11, 128, %s366_s4, [#allocation6]  }
  0xf0   :  { %266 = dma.done.wait [#allocation6], 128  }
  0xf1   :  { %267 = vsyncadd [#allocation6], 4294967168 }
  0xf2   :  { %140 = vsyncpa [#allocation5], 1 }
  0xf3   :  { %141 = vsyncpa [#allocation8], 1 }
  0xf4   :  { %142 = vsyncpa [#allocation6], 1 }

</bundles_post_ra>
